<compile_context>
chip_gen: v6e
topology: v6e:2x2x1
jax: 0.10.0
libtpu: 0.0.40
codegen_flags: <defaults>
</compile_context>

<pallas_src>
import jax
import jax.numpy as jnp
from jax.experimental import pallas as pl
from jax.experimental.pallas import tpu as pltpu

N_OUT = 2           # ToyModel(output=2): [mean head, variance head]
LANES = 128
TILE_R = 8          # sublane rows per grid step -> TILE_R * 128 batch elems per step
HEAD_ROWS = 8       # MXU output rows: 0 = mean head, 1 = variance head, rest zero


def gaussian_base_kernel(x_ref, w1_ref, b1_ref, w2t_ref, b2_ref, mean_ref, var_ref):
    """One grid step: TILE_R*128 batch elements of GaussianBase(ToyModel)."""
    tile_r = x_ref.shape[0]
    h_pad = w1_ref.shape[0]

    # Weights are VMEM-resident (constant index_map).  Hoist loads and the lane
    # broadcasts out of the row loop (JAX does not CSE broadcast_in_dim).
    w1 = jnp.broadcast_to(w1_ref[...], (h_pad, LANES))        # [H_pad, 128]
    b1 = jnp.broadcast_to(b1_ref[...], (h_pad, LANES))        # [H_pad, 128]
    w2t = w2t_ref[...]                                        # [8, H_pad]
    b2 = jnp.broadcast_to(b2_ref[...], (HEAD_ROWS, LANES))    # [8, 128]

    mean_rows = []
    var_rows = []
    for s in range(tile_r):                                   # static unroll over sublane rows
        xr = x_ref[s:s + 1, :]                                # [1, 128], batch on lanes
        # Hidden layer: Linear(1, H) + tanh (Dropout = eval-mode identity).
        h = jnp.tanh(w1 * xr + b1)                            # [H_pad, 128]
        # Both heads in one (8,128)-aligned MXU matmul with f32 accumulation.
        heads = jnp.dot(w2t, h, preferred_element_type=jnp.float32) + b2   # [8, 128]

        mean_rows.append(heads[0:1, :])                       # mean head row
        v_pre = heads[1:2, :]                                 # variance head row
        # Numerically stable softplus + 1e-6, as in GaussianBase.forward.
        var_rows.append(jnp.maximum(v_pre, 0.0)
                        + jnp.log1p(jnp.exp(-jnp.abs(v_pre))) + 1e-6)

    # One lane-dense [TILE_R, 128] store per output (no masked partial stores).
    mean_ref[...] = jnp.concatenate(mean_rows, axis=0)
    var_ref[...] = jnp.concatenate(var_rows, axis=0)


@jax.jit
def gaussian_base_forward(x, w1, b1, w2, b2):
    """x: [N, 1]; fc1 weight [H, 1] / bias [H]; fc2 weight [2, H] / bias [2].

    Returns (mean [N], variance [N]) matching GaussianBase.forward in f32.
    """
    n = x.shape[0]
    h_in = w1.shape[0]
    h_pad = ((h_in + 7) // 8) * 8                 # pad hidden size to a sublane multiple

    # fc1 params as [H_pad, 1] columns.  Padded hidden units contribute nothing:
    # tanh(0 * x + 0) = 0 and their fc2 columns are zero too.
    w1c = jnp.pad(w1.astype(jnp.float32), ((0, h_pad - h_in), (0, 0)))            # [H_pad, 1]
    b1c = jnp.pad(b1.astype(jnp.float32), (0, h_pad - h_in)).reshape(h_pad, 1)    # [H_pad, 1]

    # fc2 as an [8, H_pad] MXU tile: row 0 = mean head, row 1 = variance head.
    w2t = jnp.pad(w2.astype(jnp.float32),
                  ((0, HEAD_ROWS - N_OUT), (0, h_pad - h_in)))                    # [8, H_pad]
    b2c = jnp.pad(b2.astype(jnp.float32), (0, HEAD_ROWS - N_OUT)).reshape(HEAD_ROWS, 1)

    # Lane-dense batch layout: [N, 1] -> [rows, 128], padded to whole tiles.
    tile_elems = TILE_R * LANES
    n_pad = ((n + tile_elems - 1) // tile_elems) * tile_elems
    rows = n_pad // LANES
    xr = jnp.pad(x.reshape(-1).astype(jnp.float32), (0, n_pad - n)).reshape(rows, LANES)
    grid = (n_pad // tile_elems,)

    cost = pl.CostEstimate(
        flops=int(n_pad * (2 * h_pad + 2 * HEAD_ROWS * h_pad + 4)),
        transcendentals=int(n_pad * (h_pad + 2)),
        bytes_accessed=int(4 * 3 * n_pad + 4 * (2 * h_pad + HEAD_ROWS * (h_pad + 1))),
    )

    mean2d, var2d = pl.pallas_call(
        gaussian_base_kernel,
        out_shape=(
            jax.ShapeDtypeStruct((rows, LANES), jnp.float32),   # mean (lane-dense)
            jax.ShapeDtypeStruct((rows, LANES), jnp.float32),   # variance (lane-dense)
        ),
        grid=grid,
        in_specs=[
            pl.BlockSpec((TILE_R, LANES), lambda i: (i, 0)),     # x tile (pipelined)
            pl.BlockSpec((h_pad, 1), lambda i: (0, 0)),          # fc1 weight (VMEM-resident)
            pl.BlockSpec((h_pad, 1), lambda i: (0, 0)),          # fc1 bias
            pl.BlockSpec((HEAD_ROWS, h_pad), lambda i: (0, 0)),  # fc2 weight (both heads)
            pl.BlockSpec((HEAD_ROWS, 1), lambda i: (0, 0)),      # fc2 bias
        ],
        out_specs=(
            pl.BlockSpec((TILE_R, LANES), lambda i: (i, 0)),     # mean tile
            pl.BlockSpec((TILE_R, LANES), lambda i: (i, 0)),     # variance tile
        ),
        compiler_params=pltpu.CompilerParams(
            dimension_semantics=("parallel",),   # 2x on v7x (2 TCs); no-op on v5e/v6e
        ),
        cost_estimate=cost,
    )(xr, w1c, b1c, w2t, b2c)

    mean = mean2d.reshape(-1)[:n]
    variance = var2d.reshape(-1)[:n]
    return mean, variance


def reference_forward(x, w1, b1, w2, b2):
    """Pure-JAX reference mirroring the PyTorch modules (exact f32)."""
    h = jnp.tanh(x @ w1.T + b1[None, :])          # [N, H]   (Dropout = eval identity)
    out = h @ w2.T + b2[None, :]                  # [N, 2]
    mean = out[:, 0]
    variance = jax.nn.softplus(out[:, 1]) + 1e-6
    return mean, variance


if __name__ == "__main__":
    N = 2000     # batch (pads to 2048 -> 2 pipelined grid steps of 8 x 128)
    H = 32       # hidden_size (PyTorch default is 100; small shape for the demo)

    key = jax.random.PRNGKey(0)
    ks = jax.random.split(key, 5)

    # Deterministic init, PyTorch-Linear-style uniform ranges.
    x = jax.random.normal(ks[0], (N, 1), dtype=jnp.float32)
    lim1 = 1.0                          # 1/sqrt(in_features=1)
    w1 = jax.random.uniform(ks[1], (H, 1), jnp.float32, -lim1, lim1)
    b1 = jax.random.uniform(ks[2], (H,), jnp.float32, -lim1, lim1)
    lim2 = 1.0 / (H ** 0.5)
    w2 = jax.random.uniform(ks[3], (N_OUT, H), jnp.float32, -lim2, lim2)
    b2 = jax.random.uniform(ks[4], (N_OUT,), jnp.float32, -lim2, lim2)

    mean, variance = gaussian_base_forward(x, w1, b1, w2, b2)
    jax.block_until_ready((mean, variance))

    mean_ref, var_ref = reference_forward(x, w1, b1, w2, b2)
    assert mean.shape == (N,) and variance.shape == (N,)
    # Tolerance leaves headroom for the MXU's default f32 pass-precision on the fused
    # head matmul across TPU generations; with full-precision f32 emulation the
    # observed error is ~1e-6.
    assert jnp.allclose(mean, mean_ref, atol=5e-3, rtol=5e-3)
    assert jnp.allclose(variance, var_ref, atol=5e-3, rtol=5e-3)

    print("KERNEL_OK")
</pallas_src>

<mosaic_0001>
module attributes {stable_mosaic.version = 11 : i64} {
  func.func @gaussian_base_kernel(%arg0: i32, %arg1: memref<8x128xf32, #tpu.memory_space<vmem>>, %arg2: memref<32x1xf32, #tpu.memory_space<vmem>>, %arg3: memref<32x1xf32, #tpu.memory_space<vmem>>, %arg4: memref<8x32xf32, #tpu.memory_space<vmem>>, %arg5: memref<8x1xf32, #tpu.memory_space<vmem>>, %arg6: memref<8x128xf32, #tpu.memory_space<vmem>>, %arg7: memref<8x128xf32, #tpu.memory_space<vmem>>) attributes {dimension_semantics = [#tpu.dimension_semantics<parallel>], iteration_bounds = array<i64: 2>, scalar_prefetch = 0 : i64, scratch_operands = 0 : i64, tpu.core_type = #tpu.core_type<tc>, window_params = [{transform_indices = @transform_0, window_bounds = array<i64: 8, 128>}, {pipeline_mode = #tpu.pipeline_mode<synchronous>, transform_indices = @transform_1, window_bounds = array<i64: 32, 1>}, {pipeline_mode = #tpu.pipeline_mode<synchronous>, transform_indices = @transform_2, window_bounds = array<i64: 32, 1>}, {pipeline_mode = #tpu.pipeline_mode<synchronous>, transform_indices = @transform_3, window_bounds = array<i64: 8, 32>}, {pipeline_mode = #tpu.pipeline_mode<synchronous>, transform_indices = @transform_4, window_bounds = array<i64: 8, 1>}, {transform_indices = @transform_5, window_bounds = array<i64: 8, 128>}, {transform_indices = @transform_6, window_bounds = array<i64: 8, 128>}]} {
    %c0 = arith.constant 0 : index
    %c0_0 = arith.constant 0 : index
    %0 = vector.load %arg2[%c0, %c0_0] : memref<32x1xf32, #tpu.memory_space<vmem>>, vector<32x1xf32>
    %1 = vector.shape_cast %0 : vector<32x1xf32> to vector<32x1xf32>
    %2 = vector.broadcast %1 : vector<32x1xf32> to vector<32x128xf32>
    %c0_1 = arith.constant 0 : index
    %c0_2 = arith.constant 0 : index
    %3 = vector.load %arg3[%c0_1, %c0_2] : memref<32x1xf32, #tpu.memory_space<vmem>>, vector<32x1xf32>
    %4 = vector.shape_cast %3 : vector<32x1xf32> to vector<32x1xf32>
    %5 = vector.broadcast %4 : vector<32x1xf32> to vector<32x128xf32>
    %c0_3 = arith.constant 0 : index
    %c0_4 = arith.constant 0 : index
    %6 = vector.load %arg4[%c0_3, %c0_4] : memref<8x32xf32, #tpu.memory_space<vmem>>, vector<8x32xf32>
    %c0_5 = arith.constant 0 : index
    %c0_6 = arith.constant 0 : index
    %7 = vector.load %arg5[%c0_5, %c0_6] : memref<8x1xf32, #tpu.memory_space<vmem>>, vector<8x1xf32>
    %8 = vector.shape_cast %7 : vector<8x1xf32> to vector<8x1xf32>
    %9 = vector.broadcast %8 : vector<8x1xf32> to vector<8x128xf32>
    %c0_7 = arith.constant 0 : index
    %c0_8 = arith.constant 0 : index
    %10 = vector.load %arg1[%c0_7, %c0_8] : memref<8x128xf32, #tpu.memory_space<vmem>>, vector<1x128xf32>
    %11 = vector.broadcast %10 : vector<1x128xf32> to vector<32x128xf32>
    %12 = arith.mulf %2, %11 : vector<32x128xf32>
    %13 = arith.addf %12, %5 : vector<32x128xf32>
    %14 = math.tanh %13 : vector<32x128xf32>
    %cst = arith.constant dense<0.000000e+00> : vector<8x128xf32>
    %15 = tpu.matmul %6, %14, %cst {dimension_numbers = #tpu.dot_dimension_numbers<[1], [0], [0], [1], [0, 0, 1, 1], [], []>} : vector<8x32xf32>, vector<32x128xf32>, vector<8x128xf32> -> vector<8x128xf32>
    %16 = arith.addf %15, %9 : vector<8x128xf32>
    %17 = vector.extract_strided_slice %16 {offsets = [0, 0], sizes = [1, 128], strides = [1, 1]} : vector<8x128xf32> to vector<1x128xf32>
    %18 = vector.extract_strided_slice %16 {offsets = [1, 0], sizes = [1, 128], strides = [1, 1]} : vector<8x128xf32> to vector<1x128xf32>
    %cst_9 = arith.constant 0.000000e+00 : f32
    %19 = vector.broadcast %cst_9 : f32 to vector<1x128xf32>
    %20 = arith.maximumf %18, %19 : vector<1x128xf32>
    %21 = math.absf %18 : vector<1x128xf32>
    %cst_10 = arith.constant 0.000000e+00 : f32
    %22 = vector.broadcast %cst_10 : f32 to vector<1x128xf32>
    %23 = arith.subf %22, %21 : vector<1x128xf32>
    %24 = math.exp %23 : vector<1x128xf32>
    %25 = math.log1p %24 : vector<1x128xf32>
    %26 = arith.addf %20, %25 : vector<1x128xf32>
    %cst_11 = arith.constant 9.99999997E-7 : f32
    %27 = vector.broadcast %cst_11 : f32 to vector<1x128xf32>
    %28 = arith.addf %26, %27 : vector<1x128xf32>
    %c1 = arith.constant 1 : index
    %c0_12 = arith.constant 0 : index
    %29 = vector.load %arg1[%c1, %c0_12] : memref<8x128xf32, #tpu.memory_space<vmem>>, vector<1x128xf32>
    %30 = vector.broadcast %29 : vector<1x128xf32> to vector<32x128xf32>
    %31 = arith.mulf %2, %30 : vector<32x128xf32>
    %32 = arith.addf %31, %5 : vector<32x128xf32>
    %33 = math.tanh %32 : vector<32x128xf32>
    %cst_13 = arith.constant dense<0.000000e+00> : vector<8x128xf32>
    %34 = tpu.matmul %6, %33, %cst_13 {dimension_numbers = #tpu.dot_dimension_numbers<[1], [0], [0], [1], [0, 0, 1, 1], [], []>} : vector<8x32xf32>, vector<32x128xf32>, vector<8x128xf32> -> vector<8x128xf32>
    %35 = arith.addf %34, %9 : vector<8x128xf32>
    %36 = vector.extract_strided_slice %35 {offsets = [0, 0], sizes = [1, 128], strides = [1, 1]} : vector<8x128xf32> to vector<1x128xf32>
    %37 = vector.extract_strided_slice %35 {offsets = [1, 0], sizes = [1, 128], strides = [1, 1]} : vector<8x128xf32> to vector<1x128xf32>
    %cst_14 = arith.constant 0.000000e+00 : f32
    %38 = vector.broadcast %cst_14 : f32 to vector<1x128xf32>
    %39 = arith.maximumf %37, %38 : vector<1x128xf32>
    %40 = math.absf %37 : vector<1x128xf32>
    %cst_15 = arith.constant 0.000000e+00 : f32
    %41 = vector.broadcast %cst_15 : f32 to vector<1x128xf32>
    %42 = arith.subf %41, %40 : vector<1x128xf32>
    %43 = math.exp %42 : vector<1x128xf32>
    %44 = math.log1p %43 : vector<1x128xf32>
    %45 = arith.addf %39, %44 : vector<1x128xf32>
    %cst_16 = arith.constant 9.99999997E-7 : f32
    %46 = vector.broadcast %cst_16 : f32 to vector<1x128xf32>
    %47 = arith.addf %45, %46 : vector<1x128xf32>
    %c2 = arith.constant 2 : index
    %c0_17 = arith.constant 0 : index
    %48 = vector.load %arg1[%c2, %c0_17] : memref<8x128xf32, #tpu.memory_space<vmem>>, vector<1x128xf32>
    %49 = vector.broadcast %48 : vector<1x128xf32> to vector<32x128xf32>
    %50 = arith.mulf %2, %49 : vector<32x128xf32>
    %51 = arith.addf %50, %5 : vector<32x128xf32>
    %52 = math.tanh %51 : vector<32x128xf32>
    %cst_18 = arith.constant dense<0.000000e+00> : vector<8x128xf32>
    %53 = tpu.matmul %6, %52, %cst_18 {dimension_numbers = #tpu.dot_dimension_numbers<[1], [0], [0], [1], [0, 0, 1, 1], [], []>} : vector<8x32xf32>, vector<32x128xf32>, vector<8x128xf32> -> vector<8x128xf32>
    %54 = arith.addf %53, %9 : vector<8x128xf32>
    %55 = vector.extract_strided_slice %54 {offsets = [0, 0], sizes = [1, 128], strides = [1, 1]} : vector<8x128xf32> to vector<1x128xf32>
    %56 = vector.extract_strided_slice %54 {offsets = [1, 0], sizes = [1, 128], strides = [1, 1]} : vector<8x128xf32> to vector<1x128xf32>
    %cst_19 = arith.constant 0.000000e+00 : f32
    %57 = vector.broadcast %cst_19 : f32 to vector<1x128xf32>
    %58 = arith.maximumf %56, %57 : vector<1x128xf32>
    %59 = math.absf %56 : vector<1x128xf32>
    %cst_20 = arith.constant 0.000000e+00 : f32
    %60 = vector.broadcast %cst_20 : f32 to vector<1x128xf32>
    %61 = arith.subf %60, %59 : vector<1x128xf32>
    %62 = math.exp %61 : vector<1x128xf32>
    %63 = math.log1p %62 : vector<1x128xf32>
    %64 = arith.addf %58, %63 : vector<1x128xf32>
    %cst_21 = arith.constant 9.99999997E-7 : f32
    %65 = vector.broadcast %cst_21 : f32 to vector<1x128xf32>
    %66 = arith.addf %64, %65 : vector<1x128xf32>
    %c3 = arith.constant 3 : index
    %c0_22 = arith.constant 0 : index
    %67 = vector.load %arg1[%c3, %c0_22] : memref<8x128xf32, #tpu.memory_space<vmem>>, vector<1x128xf32>
    %68 = vector.broadcast %67 : vector<1x128xf32> to vector<32x128xf32>
    %69 = arith.mulf %2, %68 : vector<32x128xf32>
    %70 = arith.addf %69, %5 : vector<32x128xf32>
    %71 = math.tanh %70 : vector<32x128xf32>
    %cst_23 = arith.constant dense<0.000000e+00> : vector<8x128xf32>
    %72 = tpu.matmul %6, %71, %cst_23 {dimension_numbers = #tpu.dot_dimension_numbers<[1], [0], [0], [1], [0, 0, 1, 1], [], []>} : vector<8x32xf32>, vector<32x128xf32>, vector<8x128xf32> -> vector<8x128xf32>
    %73 = arith.addf %72, %9 : vector<8x128xf32>
    %74 = vector.extract_strided_slice %73 {offsets = [0, 0], sizes = [1, 128], strides = [1, 1]} : vector<8x128xf32> to vector<1x128xf32>
    %75 = vector.extract_strided_slice %73 {offsets = [1, 0], sizes = [1, 128], strides = [1, 1]} : vector<8x128xf32> to vector<1x128xf32>
    %cst_24 = arith.constant 0.000000e+00 : f32
    %76 = vector.broadcast %cst_24 : f32 to vector<1x128xf32>
    %77 = arith.maximumf %75, %76 : vector<1x128xf32>
    %78 = math.absf %75 : vector<1x128xf32>
    %cst_25 = arith.constant 0.000000e+00 : f32
    %79 = vector.broadcast %cst_25 : f32 to vector<1x128xf32>
    %80 = arith.subf %79, %78 : vector<1x128xf32>
    %81 = math.exp %80 : vector<1x128xf32>
    %82 = math.log1p %81 : vector<1x128xf32>
    %83 = arith.addf %77, %82 : vector<1x128xf32>
    %cst_26 = arith.constant 9.99999997E-7 : f32
    %84 = vector.broadcast %cst_26 : f32 to vector<1x128xf32>
    %85 = arith.addf %83, %84 : vector<1x128xf32>
    %c4 = arith.constant 4 : index
    %c0_27 = arith.constant 0 : index
    %86 = vector.load %arg1[%c4, %c0_27] : memref<8x128xf32, #tpu.memory_space<vmem>>, vector<1x128xf32>
    %87 = vector.broadcast %86 : vector<1x128xf32> to vector<32x128xf32>
    %88 = arith.mulf %2, %87 : vector<32x128xf32>
    %89 = arith.addf %88, %5 : vector<32x128xf32>
    %90 = math.tanh %89 : vector<32x128xf32>
    %cst_28 = arith.constant dense<0.000000e+00> : vector<8x128xf32>
    %91 = tpu.matmul %6, %90, %cst_28 {dimension_numbers = #tpu.dot_dimension_numbers<[1], [0], [0], [1], [0, 0, 1, 1], [], []>} : vector<8x32xf32>, vector<32x128xf32>, vector<8x128xf32> -> vector<8x128xf32>
    %92 = arith.addf %91, %9 : vector<8x128xf32>
    %93 = vector.extract_strided_slice %92 {offsets = [0, 0], sizes = [1, 128], strides = [1, 1]} : vector<8x128xf32> to vector<1x128xf32>
    %94 = vector.extract_strided_slice %92 {offsets = [1, 0], sizes = [1, 128], strides = [1, 1]} : vector<8x128xf32> to vector<1x128xf32>
    %cst_29 = arith.constant 0.000000e+00 : f32
    %95 = vector.broadcast %cst_29 : f32 to vector<1x128xf32>
    %96 = arith.maximumf %94, %95 : vector<1x128xf32>
    %97 = math.absf %94 : vector<1x128xf32>
    %cst_30 = arith.constant 0.000000e+00 : f32
    %98 = vector.broadcast %cst_30 : f32 to vector<1x128xf32>
    %99 = arith.subf %98, %97 : vector<1x128xf32>
    %100 = math.exp %99 : vector<1x128xf32>
    %101 = math.log1p %100 : vector<1x128xf32>
    %102 = arith.addf %96, %101 : vector<1x128xf32>
    %cst_31 = arith.constant 9.99999997E-7 : f32
    %103 = vector.broadcast %cst_31 : f32 to vector<1x128xf32>
    %104 = arith.addf %102, %103 : vector<1x128xf32>
    %c5 = arith.constant 5 : index
    %c0_32 = arith.constant 0 : index
    %105 = vector.load %arg1[%c5, %c0_32] : memref<8x128xf32, #tpu.memory_space<vmem>>, vector<1x128xf32>
    %106 = vector.broadcast %105 : vector<1x128xf32> to vector<32x128xf32>
    %107 = arith.mulf %2, %106 : vector<32x128xf32>
    %108 = arith.addf %107, %5 : vector<32x128xf32>
    %109 = math.tanh %108 : vector<32x128xf32>
    %cst_33 = arith.constant dense<0.000000e+00> : vector<8x128xf32>
    %110 = tpu.matmul %6, %109, %cst_33 {dimension_numbers = #tpu.dot_dimension_numbers<[1], [0], [0], [1], [0, 0, 1, 1], [], []>} : vector<8x32xf32>, vector<32x128xf32>, vector<8x128xf32> -> vector<8x128xf32>
    %111 = arith.addf %110, %9 : vector<8x128xf32>
    %112 = vector.extract_strided_slice %111 {offsets = [0, 0], sizes = [1, 128], strides = [1, 1]} : vector<8x128xf32> to vector<1x128xf32>
    %113 = vector.extract_strided_slice %111 {offsets = [1, 0], sizes = [1, 128], strides = [1, 1]} : vector<8x128xf32> to vector<1x128xf32>
    %cst_34 = arith.constant 0.000000e+00 : f32
    %114 = vector.broadcast %cst_34 : f32 to vector<1x128xf32>
    %115 = arith.maximumf %113, %114 : vector<1x128xf32>
    %116 = math.absf %113 : vector<1x128xf32>
    %cst_35 = arith.constant 0.000000e+00 : f32
    %117 = vector.broadcast %cst_35 : f32 to vector<1x128xf32>
    %118 = arith.subf %117, %116 : vector<1x128xf32>
    %119 = math.exp %118 : vector<1x128xf32>
    %120 = math.log1p %119 : vector<1x128xf32>
    %121 = arith.addf %115, %120 : vector<1x128xf32>
    %cst_36 = arith.constant 9.99999997E-7 : f32
    %122 = vector.broadcast %cst_36 : f32 to vector<1x128xf32>
    %123 = arith.addf %121, %122 : vector<1x128xf32>
    %c6 = arith.constant 6 : index
    %c0_37 = arith.constant 0 : index
    %124 = vector.load %arg1[%c6, %c0_37] : memref<8x128xf32, #tpu.memory_space<vmem>>, vector<1x128xf32>
    %125 = vector.broadcast %124 : vector<1x128xf32> to vector<32x128xf32>
    %126 = arith.mulf %2, %125 : vector<32x128xf32>
    %127 = arith.addf %126, %5 : vector<32x128xf32>
    %128 = math.tanh %127 : vector<32x128xf32>
    %cst_38 = arith.constant dense<0.000000e+00> : vector<8x128xf32>
    %129 = tpu.matmul %6, %128, %cst_38 {dimension_numbers = #tpu.dot_dimension_numbers<[1], [0], [0], [1], [0, 0, 1, 1], [], []>} : vector<8x32xf32>, vector<32x128xf32>, vector<8x128xf32> -> vector<8x128xf32>
    %130 = arith.addf %129, %9 : vector<8x128xf32>
    %131 = vector.extract_strided_slice %130 {offsets = [0, 0], sizes = [1, 128], strides = [1, 1]} : vector<8x128xf32> to vector<1x128xf32>
    %132 = vector.extract_strided_slice %130 {offsets = [1, 0], sizes = [1, 128], strides = [1, 1]} : vector<8x128xf32> to vector<1x128xf32>
    %cst_39 = arith.constant 0.000000e+00 : f32
    %133 = vector.broadcast %cst_39 : f32 to vector<1x128xf32>
    %134 = arith.maximumf %132, %133 : vector<1x128xf32>
    %135 = math.absf %132 : vector<1x128xf32>
    %cst_40 = arith.constant 0.000000e+00 : f32
    %136 = vector.broadcast %cst_40 : f32 to vector<1x128xf32>
    %137 = arith.subf %136, %135 : vector<1x128xf32>
    %138 = math.exp %137 : vector<1x128xf32>
    %139 = math.log1p %138 : vector<1x128xf32>
    %140 = arith.addf %134, %139 : vector<1x128xf32>
    %cst_41 = arith.constant 9.99999997E-7 : f32
    %141 = vector.broadcast %cst_41 : f32 to vector<1x128xf32>
    %142 = arith.addf %140, %141 : vector<1x128xf32>
    %c7 = arith.constant 7 : index
    %c0_42 = arith.constant 0 : index
    %143 = vector.load %arg1[%c7, %c0_42] : memref<8x128xf32, #tpu.memory_space<vmem>>, vector<1x128xf32>
    %144 = vector.broadcast %143 : vector<1x128xf32> to vector<32x128xf32>
    %145 = arith.mulf %2, %144 : vector<32x128xf32>
    %146 = arith.addf %145, %5 : vector<32x128xf32>
    %147 = math.tanh %146 : vector<32x128xf32>
    %cst_43 = arith.constant dense<0.000000e+00> : vector<8x128xf32>
    %148 = tpu.matmul %6, %147, %cst_43 {dimension_numbers = #tpu.dot_dimension_numbers<[1], [0], [0], [1], [0, 0, 1, 1], [], []>} : vector<8x32xf32>, vector<32x128xf32>, vector<8x128xf32> -> vector<8x128xf32>
    %149 = arith.addf %148, %9 : vector<8x128xf32>
    %150 = vector.extract_strided_slice %149 {offsets = [0, 0], sizes = [1, 128], strides = [1, 1]} : vector<8x128xf32> to vector<1x128xf32>
    %151 = vector.extract_strided_slice %149 {offsets = [1, 0], sizes = [1, 128], strides = [1, 1]} : vector<8x128xf32> to vector<1x128xf32>
    %cst_44 = arith.constant 0.000000e+00 : f32
    %152 = vector.broadcast %cst_44 : f32 to vector<1x128xf32>
    %153 = arith.maximumf %151, %152 : vector<1x128xf32>
    %154 = math.absf %151 : vector<1x128xf32>
    %cst_45 = arith.constant 0.000000e+00 : f32
    %155 = vector.broadcast %cst_45 : f32 to vector<1x128xf32>
    %156 = arith.subf %155, %154 : vector<1x128xf32>
    %157 = math.exp %156 : vector<1x128xf32>
    %158 = math.log1p %157 : vector<1x128xf32>
    %159 = arith.addf %153, %158 : vector<1x128xf32>
    %cst_46 = arith.constant 9.99999997E-7 : f32
    %160 = vector.broadcast %cst_46 : f32 to vector<1x128xf32>
    %161 = arith.addf %159, %160 : vector<1x128xf32>
    %162 = tpu.concatenate %17, %36, %55, %74, %93, %112, %131, %150 in 0 : vector<1x128xf32>, vector<1x128xf32>, vector<1x128xf32>, vector<1x128xf32>, vector<1x128xf32>, vector<1x128xf32>, vector<1x128xf32>, vector<1x128xf32> -> vector<8x128xf32>
    %c0_47 = arith.constant 0 : index
    %c0_48 = arith.constant 0 : index
    %163 = vector.load %arg6[%c0_47, %c0_48] : memref<8x128xf32, #tpu.memory_space<vmem>>, vector<8x128xf32>
    tpu.vector_store %arg6[%c0_47, %c0_48], %162 {strides = array<i32>} : memref<8x128xf32, #tpu.memory_space<vmem>>, vector<8x128xf32>,
    %164 = tpu.concatenate %28, %47, %66, %85, %104, %123, %142, %161 in 0 : vector<1x128xf32>, vector<1x128xf32>, vector<1x128xf32>, vector<1x128xf32>, vector<1x128xf32>, vector<1x128xf32>, vector<1x128xf32>, vector<1x128xf32> -> vector<8x128xf32>
    %c0_49 = arith.constant 0 : index
    %c0_50 = arith.constant 0 : index
    %165 = vector.load %arg7[%c0_49, %c0_50] : memref<8x128xf32, #tpu.memory_space<vmem>>, vector<8x128xf32>
    tpu.vector_store %arg7[%c0_49, %c0_50], %164 {strides = array<i32>} : memref<8x128xf32, #tpu.memory_space<vmem>>, vector<8x128xf32>,
    return
  }
  func.func @transform_0(%arg0: i32) -> (i32, i32) {
    %c0_i32 = arith.constant 0 : i32
    %c0_i32_0 = arith.constant 0 : i32
    return %arg0, %c0_i32 : i32, i32
  }
  func.func @transform_1(%arg0: i32) -> (i32, i32) {
    %c0_i32 = arith.constant 0 : i32
    %c0_i32_0 = arith.constant 0 : i32
    %c0_i32_1 = arith.constant 0 : i32
    return %c0_i32, %c0_i32_0 : i32, i32
  }
  func.func @transform_2(%arg0: i32) -> (i32, i32) {
    %c0_i32 = arith.constant 0 : i32
    %c0_i32_0 = arith.constant 0 : i32
    %c0_i32_1 = arith.constant 0 : i32
    return %c0_i32, %c0_i32_0 : i32, i32
  }
  func.func @transform_3(%arg0: i32) -> (i32, i32) {
    %c0_i32 = arith.constant 0 : i32
    %c0_i32_0 = arith.constant 0 : i32
    %c0_i32_1 = arith.constant 0 : i32
    return %c0_i32, %c0_i32_0 : i32, i32
  }
  func.func @transform_4(%arg0: i32) -> (i32, i32) {
    %c0_i32 = arith.constant 0 : i32
    %c0_i32_0 = arith.constant 0 : i32
    %c0_i32_1 = arith.constant 0 : i32
    return %c0_i32, %c0_i32_0 : i32, i32
  }
  func.func @transform_5(%arg0: i32) -> (i32, i32) {
    %c0_i32 = arith.constant 0 : i32
    %c0_i32_0 = arith.constant 0 : i32
    return %arg0, %c0_i32 : i32, i32
  }
  func.func @transform_6(%arg0: i32) -> (i32, i32) {
    %c0_i32 = arith.constant 0 : i32
    %c0_i32_0 = arith.constant 0 : i32
    return %arg0, %c0_i32 : i32, i32
  }
}

</mosaic_0001>

<bundles_post_ra>
// kernel: gaussian_base_forward.1
= control target key start
LH: loop header
LB: loop body
LE: loop exit
PB: predicated region body
PF: predicated region fallthrough
CT: control target
= control target key end

     0   :  { %12 = vsyncpa [#allocation3], 0  ;;  %s2212_s0 = inlined_call_operand.vmem [shape: f32[16,128], index: 0, kind: input, shape index: {}]   ;;  %s2213_s1 = inlined_call_operand.vmem [shape: f32[32,1], index: 1, kind: input, shape index: {}]   ;;  %s2214_s2 = inlined_call_operand.vmem [shape: f32[32,1], index: 2, kind: input, shape index: {}]   ;;  %s2215_s3 = inlined_call_operand.vmem [shape: f32[8,32], index: 3, kind: input, shape index: {}]   ;;  %s2216_s4 = inlined_call_operand.vmem [shape: f32[8,1], index: 4, kind: input, shape index: {}]   ;;  %s2217_s5 = inlined_call_operand.hbm [shape: f32[16,128], index: 5, kind: output, shape index: {0}]   ;;  %s2218_s6 = inlined_call_operand.hbm [shape: f32[16,128], index: 6, kind: output, shape index: {1}]  }
   0x1   :  { %14 = vsyncpa [#allocation3 + $0x1], 0 }
   0x2   :  { %15 = vsyncpa [#allocation5], 0 }
   0x3   :  { %17 = vsyncpa [#allocation5 + $0x1], 0  ;;  %s1763_s21 = smov 0   ;;  %s1765_s22 = smov 0  }
   0x4   :  { %s1767_s23 = smov 0   ;;  %s1769_s24 = smov 0  }
   0x5 LB: > { %s1784_s25 = sadd.s32 4294967295, %s1721_s24   ;;  %s1329_s26 = sadd.s32 4294967294, %s1721_s24   ;;  %s1721_s24 = sphi %s1769_s24, %s2230_s24   ;;  %s1717_s23 = sphi %s1767_s23, %s2229_s23   ;;  %s1713_s22 = sphi %s1765_s22, %s2228_s22   ;;  %s1709_s21 = sphi %s1763_s21, %s2227_s21  }
   0x6   : > { %s1788_s27 = sadd.s32 1, %s1721_s24   ;;  %s140_s28 = sadd.s32 1, %s1717_s23 }
   0x7   : > { %s137_s29 = ssub.s32 %s1721_s24, %s1788_s27  ;;  %p150_p0 = scmp.ne.s32.totalorder %s1717_s23, %s1713_s22 }
   0x8   : > { %p138_p1 = scmp.eq.s32.totalorder %s137_s29, 0  ;;  %p151_p2 = scmp.eq.s32.totalorder %s1784_s25, 1 }
   0x9   : > { %p156_p3 = scmp.ne.s32.totalorder %s1713_s22, %s1709_s21  ;;  %p157_p4 = scmp.eq.s32.totalorder %s1329_s26, 1 }
   0xa   : > { %s1799_s30 = scalar_select %p138_p1, %s1717_s23, %s140_s28  }
   0xb   : > { %p1801_p5 = por %p151_p2, %p150_p0  ;;  %p1805_p6 = por %p157_p4, %p156_p3 }
   0xc   : > { %p1332_p7 = scmp.ge.s32.totalorder %s1721_s24, 1  ;;  %p220_p8 = scmp.lt.s32.totalorder %s1721_s24, 3 }
   0xe   : > { %p221_p9 = pnand %p1332_p7, %p220_p8 }
   0xf   : > { %p254_p10 = scmp.lt.s32.totalorder (!%p221_p9), %s1784_s25, 1  ;;  %s2043_s19 = sand.u32 (!%p221_p9), 1, %s1713_s22  }
  0x10   : > { %224 = sbr.rel (%p221_p9) target bundleno = 476 (0x1dc), region = 40  ;;  %s1333_s20 = sshll.u32 (!%p221_p9), %s2043_s19, 3 }
  0x11   : > { %s1354_s26 = sshll.u32 (!%p221_p9), %s1784_s25, 7  ;;  %s246_s28 = scalar_lea.vmem (!%p221_p9), [#allocation2], %s1333_s20 }
  0x12   : > { %s1225_s29 = sshll.u32 (!%p221_p9), %s246_s28, 4  ;;  %s2080_s11 = scalar_lea.hbm (!%p221_p9), %s2217_s5, %s1354_s26  ;;  %s2082_s29 = int_to_ptr.vmem [resolvable:$true] %s1225_s29 }
  0x13   : > { %s1726_s14 = smov (!%p221_p9), [#allocation2]  }
  0x14   : > { %s1635_s15 = sshll.u32 (!%p221_p9), %s1726_s14, 4  ;;  %s1636_s15 = int_to_ptr.vmem [resolvable:$false] %s1635_s15 }
  0x15   : > { %v285_v0 = vld [vmem:[%s2214_s2 + $0x18] sm:$0xff]  ;;  %v1723_v2 = vmov 0   ;;  %v260_v3 = vld [vmem:[%s2213_s1 + $0x10] sm:$0xff]  ;;  %v259_v4 = vld [vmem:[%s2213_s1 + $0x8] sm:$0xff]  ;;  %v1724_v10 = vmov 0.0   ;;  %vm1725_vm0 = vmmov 0   ;;  %p1638_p0 = scmp.lt.s32.totalorder %s2082_s29, %s1636_s15 }
  0x16   : > { %v261_v1 = vld [vmem:[%s2213_s1 + $0x18] sm:$0xff]  ;;  %1534 = vset.pattern.permute.xlu1 %v1723_v2  ;;  %1533 = vset.pattern.permute.xlu0 %v1723_v2  ;;  %v284_v5 = vld [vmem:[%s2214_s2 + $0x10] sm:$0xff]  ;;  %v258_v6 = vld [vmem:[%s2213_s1] sm:$0xff]  ;;  %s255_s12 = scalar_select %p254_p10, %s1784_s25, 1  ;;  %vm330_vm1 = vcmask 261120   ;;  %vm1162_vm2 = vcmask 1040384  }
  0x17   : > { %303 = vperm.xlu1 %1534, %v285_v0   ;;  %279 = vperm.xlu0 %1533, %v261_v1   ;;  %v283_v7 = vld [vmem:[%s2214_s2 + $0x8] sm:$0xff]  ;;  %v282_v8 = vld [vmem:[%s2214_s2] sm:$0xff]  ;;  %vm1164_vm3 = vcmask 1041408   ;;  %vm1166_vm4 = vcmask 1042432   ;;  %vm1168_vm5 = vcmask 1043456   ;;  %vm1170_vm6 = vcmask 1044480  }
  0x18   : > { %v307_v9 = vld [vmem:[%s2216_s4] sm:$0xff]  ;;  %1398 = vmatprep.subr.mxu0 %v1724_v10  ;;  %1409 = vmatprep.subr.mxu1 %v1724_v10  ;;  %s1335_s13 = sshll.u32 %s255_s12, 3  ;;  %vm1172_vm7 = vcmask 1045504   ;;  %vm1174_vm8 = vcmask 1046528   ;;  %s1207_s12 = scalar_lea.sflag [#allocation3], %s2043_s19 }
  0x19   : > { %1406 = vmatprep.mubr.msk.f32.mxu0 %vm1725_vm0, %v1724_v10  ;;  %1417 = vmatprep.mubr.msk.f32.mxu1 %vm1725_vm0, %v1724_v10  ;;  %s1855_s16 = scalar_lea.vmem %s2212_s0, %s1335_s13  ;;  %s1631_s13 = scalar_lea.vmem %s2082_s29, 128 }
  0x1a   : > { %v1336_v15 = vld [vmem:[%s1855_s16] ss:$0 sm:$0xff]  ;;  %v1338_v17 = vld [vmem:[%s1855_s16 + $0x1] ss:$0 sm:$0xff]  ;;  %v1340_v30 = vld [vmem:[%s1855_s16 + $0x2] ss:$0 sm:$0xff]  ;;  %p1632_p11 = scmp.ne.s32.totalorder %s2082_s29, %s1631_s13 }
  0x1b   : > { %274 = vperm.xlu0 %1533, %v260_v3   ;;  %269 = vperm.xlu1 %1534, %v259_v4   ;;  %v1342_v32 = vld [vmem:[%s1855_s16 + $0x3] ss:$0 sm:$0xff]  ;;  %v1344_v47 = vld [vmem:[%s1855_s16 + $0x4] ss:$0 sm:$0xff]  ;;  %v1346_v50 = vld [vmem:[%s1855_s16 + $0x5] ss:$0 sm:$0xff] }
  0x1c   : > { %p1633_p12 = pnand %p1632_p11, %p1801_p5 }
  0x1e   : > { %p1634_p13 = pneg %p1633_p12 }
  0x1f   : > { %298 = vperm.xlu0 %1533, %v284_v5   ;;  %264 = vperm.xlu1 %1534, %v258_v6  }
  0x23   : > { %293 = vperm.xlu0 %1533, %v283_v7   ;;  %288 = vperm.xlu1 %1534, %v282_v8   ;;  %v1917_v7 = vld [vmem:[%s1855_s16 + $0x6] ss:$0 sm:$0xff] }
  0x27   : > { %310 = vperm.xlu0 %1533, %v307_v9  }
  0x92   : > { %v1845_v11 = vpop.permute.xlu0 %279  ;;  %v1848_v12 = vpop.permute.xlu1 %303 }
  0x93   : > { %v321_v19 = vmul.f32 %v1336_v15, %v1845_v11  ;;  %v428_v22 = vmul.f32 %v1338_v17, %v1845_v11  ;;  %v531_v36 = vmul.f32 %v1340_v30, %v1845_v11  ;;  %v634_v38 = vmul.f32 %v1342_v32, %v1845_v11 }
  0x94   : > { %v737_v56 = vmul.f32 %v1344_v47, %v1845_v11  ;;  %v840_v59 = vmul.f32 %v1346_v50, %v1845_v11 }
  0x95   : > { %v325_v27 = vadd.f32 %v321_v19, %v1848_v12  ;;  %v432_v29 = vadd.f32 %v428_v22, %v1848_v12  ;;  %v535_v41 = vadd.f32 %v531_v36, %v1848_v12  ;;  %v638_v43 = vadd.f32 %v634_v38, %v1848_v12 }
  0x96   : > { %v1850_v13 = vpop.permute.xlu0 %274  ;;  %v1857_v14 = vpop.permute.xlu1 %269  ;;  %v741_v0 = vadd.f32 %v737_v56, %v1848_v12  ;;  %v844_v3 = vadd.f32 %v840_v59, %v1848_v12 }
  0x97   : > { %v320_v18 = vmul.f32 %v1336_v15, %v1850_v13  ;;  %v427_v20 = vmul.f32 %v1338_v17, %v1850_v13  ;;  %v319_v26 = vmul.f32 %v1336_v15, %v1857_v14  ;;  %v426_v28 = vmul.f32 %v1338_v17, %v1857_v14 }
  0x98   : > { %v530_v42 = vmul.f32 %v1340_v30, %v1850_v13  ;;  %v633_v44 = vmul.f32 %v1342_v32, %v1850_v13  ;;  %v529_v45 = vmul.f32 %v1340_v30, %v1857_v14  ;;  %v632_v48 = vmul.f32 %v1342_v32, %v1857_v14 }
  0x99   : > { %v736_v1 = vmul.f32 %v1344_v47, %v1850_v13  ;;  %v839_v4 = vmul.f32 %v1346_v50, %v1850_v13  ;;  %v735_v5 = vmul.f32 %v1344_v47, %v1857_v14  ;;  %v838_v8 = vmul.f32 %v1346_v50, %v1857_v14 }
  0x9a   : > { %v1860_v16 = vpop.permute.xlu0 %298  ;;  %v1866_v21 = vpop.permute.xlu1 %264 }
  0x9b   : > { %v324_v23 = vadd.f32 %v320_v18, %v1860_v16  ;;  %v431_v24 = vadd.f32 %v427_v20, %v1860_v16  ;;  %v318_v35 = vmul.f32 %v1336_v15, %v1866_v21  ;;  %v425_v37 = vmul.f32 %v1338_v17, %v1866_v21  ;;  %v1925_v15 = vld [vmem:[%s2215_s3] sm:$0xff] }
  0x9c   : > { %v534_v46 = vadd.f32 %v530_v42, %v1860_v16  ;;  %v637_v49 = vadd.f32 %v633_v44, %v1860_v16  ;;  %v528_v52 = vmul.f32 %v1340_v30, %v1866_v21  ;;  %v631_v54 = vmul.f32 %v1342_v32, %v1866_v21  ;;  %v1350_v18 = vld [vmem:[%s1855_s16 + $0x7] ss:$0 sm:$0xff]  ;;  %s1637_s16 = scalar_lea.vmem %s1636_s15, 256 }
  0x9d   : > { %1535 = vtanh.f32 %v324_v23  ;;  %v740_v6 = vadd.f32 %v736_v1, %v1860_v16  ;;  %v843_v9 = vadd.f32 %v839_v4, %v1860_v16  ;;  %v734_v20 = vmul.f32 %v1344_v47, %v1866_v21  ;;  %p1639_p1 = scmp.lt.s32.totalorder %s1637_s16, %s1631_s13 }
  0x9e   : > { %v1871_v25 = vpop.permute.xlu0 %293  ;;  %1537 = vtanh.f32 %v431_v24  ;;  %v1881_v34 = vpop.permute.xlu1 %288  ;;  %v837_v24 = vmul.f32 %v1346_v50, %v1866_v21  ;;  %v1045_v38 = vmul.f32 %v1350_v18, %v1850_v13 }
  0x9f   : > { %v323_v31 = vadd.f32 %v319_v26, %v1871_v25  ;;  %v430_v33 = vadd.f32 %v426_v28, %v1871_v25  ;;  %1539 = vtanh.f32 %v325_v27  ;;  %v322_v39 = vadd.f32 %v318_v35, %v1881_v34  ;;  %p1640_p2 = por %p1639_p1, %p1638_p0 }
  0xa0   : > { %1541 = vtanh.f32 %v432_v29  ;;  %v429_v40 = vadd.f32 %v425_v37, %v1881_v34  ;;  %v533_v51 = vadd.f32 %v529_v45, %v1871_v25  ;;  %v636_v53 = vadd.f32 %v632_v48, %v1871_v25 }
  0xa1   : > { %1543 = vtanh.f32 %v323_v31  ;;  %v532_v57 = vadd.f32 %v528_v52, %v1881_v34  ;;  %v635_v60 = vadd.f32 %v631_v54, %v1881_v34  ;;  %v739_v19 = vadd.f32 %v735_v5, %v1871_v25  ;;  %p1641_p3 = pnand %p1640_p2, %p1634_p13 }
  0xa2   : > { %1545 = vtanh.f32 %v430_v33  ;;  %v842_v23 = vadd.f32 %v838_v8, %v1871_v25  ;;  %v943_v26 = vmul.f32 %v1917_v7, %v1845_v11  ;;  %v738_v27 = vadd.f32 %v734_v20, %v1881_v34 }
  0xa3   : > { %1547 = vtanh.f32 %v322_v39  ;;  %v1046_v29 = vmul.f32 %v1350_v18, %v1845_v11  ;;  %v841_v30 = vadd.f32 %v837_v24, %v1881_v34  ;;  %v942_v35 = vmul.f32 %v1917_v7, %v1850_v13 }
  0xa4   : > { %1549 = vtanh.f32 %v429_v40  ;;  %v947_v11 = vadd.f32 %v943_v26, %v1848_v12  ;;  %v941_v40 = vmul.f32 %v1917_v7, %v1857_v14  ;;  %v940_v45 = vmul.f32 %v1917_v7, %v1866_v21 }
  0xa5   : > { %1551 = vtanh.f32 %v535_v41  ;;  %v1050_v37 = vadd.f32 %v1046_v29, %v1848_v12  ;;  %v946_v41 = vadd.f32 %v942_v35, %v1860_v16  ;;  %v1049_v12 = vadd.f32 %v1045_v38, %v1860_v16 }
  0xa6   : > { %1553 = vtanh.f32 %v638_v43  ;;  %v1044_v43 = vmul.f32 %v1350_v18, %v1857_v14  ;;  %v945_v44 = vadd.f32 %v941_v40, %v1871_v25  ;;  %v1043_v14 = vmul.f32 %v1350_v18, %v1866_v21 }
  0xa7   : > { %1555 = vtanh.f32 %v534_v46  ;;  %v944_v16 = vadd.f32 %v940_v45, %v1881_v34 }
  0xa8   : > { %1557 = vtanh.f32 %v637_v49  ;;  %v1048_v46 = vadd.f32 %v1044_v43, %v1871_v25  ;;  %v1047_v48 = vadd.f32 %v1043_v14, %v1881_v34 }
  0xa9   : > { %1559 = vtanh.f32 %v533_v51 }
  0xaa   : > { %v1536_v55 = vpop.eup %1535  ;;  %1561 = vtanh.f32 %v636_v53 }
  0xab   : > { %v1538_v58 = vpop.eup %1537  ;;  %1563 = vtanh.f32 %v532_v57 }
  0xac   : > { %v1540_v61 = vpop.eup %1539  ;;  %1565 = vtanh.f32 %v635_v60 }
  0xad   : > { %v1542_v62 = vpop.eup %1541  ;;  %1399 = vmatpush3.msra.mxu0 %v1540_v61  ;;  %1567 = vtanh.f32 %v741_v0  ;;  %v2008_v61 = vpop.permute.xlu0 %310 }
  0xae   : > { %v1544_v63 = vpop.eup %1543  ;;  %1410 = vmatpush3.msra.mxu1 %v1542_v62  ;;  %1400 = vmatprep.subr.mxu0 %v1724_v10  ;;  %1569 = vtanh.f32 %v844_v3 }
  0xaf   : > { %v1546_v2 = vpop.eup %1545  ;;  %1411 = vmatprep.subr.mxu1 %v1724_v10  ;;  %1401 = vmatpush3.msra.mxu0 %v1536_v55  ;;  %1571 = vtanh.f32 %v740_v6 }
  0xb0   : > { %1412 = vmatpush3.msra.mxu1 %v1538_v58  ;;  %1402 = vmatprep.subr.mxu0 %v1724_v10  ;;  %v1548_v17 = vpop.eup %1547  ;;  %1573 = vtanh.f32 %v843_v9 }
  0xb1   : > { %1413 = vmatprep.subr.mxu1 %v1724_v10  ;;  %1403 = vmatpush3.msra.mxu0 %v1544_v63  ;;  %v1550_v22 = vpop.eup %1549  ;;  %1575 = vtanh.f32 %v739_v19 }
  0xb2   : > { %1414 = vmatpush3.msra.mxu1 %v1546_v2  ;;  %1404 = vmatprep.subr.mxu0 %v1724_v10  ;;  %v1552_v28 = vpop.eup %1551  ;;  %1577 = vtanh.f32 %v842_v23 }
  0xb3   : > { %1415 = vmatprep.subr.mxu1 %v1724_v10  ;;  %1405 = vmatpush3.msra.mxu0 %v1548_v17  ;;  %v1554_v31 = vpop.eup %1553  ;;  %1579 = vtanh.f32 %v738_v27 }
  0xb4   : > { %1416 = vmatpush3.msra.mxu1 %v1550_v22  ;;  %1407 = vmatmul.mubr.msk.f32.vlgmr.msra.gmra.mxu0 %vm330_vm1, %v1925_v15  ;;  %v1556_v32 = vpop.eup %1555  ;;  %1581 = vtanh.f32 %v841_v30 }
  0xb5   : > { %1418 = vmatmul.mubr.msk.f32.vlgmr.msra.gmra.mxu1 %vm330_vm1, %v1925_v15  ;;  %1420 = vmatprep.subr.mxu0 %v1724_v10  ;;  %v1558_v33 = vpop.eup %1557  ;;  %1583 = vtanh.f32 %v947_v11 }
  0xb6   : > { %1431 = vmatprep.subr.mxu1 %v1724_v10  ;;  %1421 = vmatpush3.msra.mxu0 %v1552_v28  ;;  %v1560_v36 = vpop.eup %1559  ;;  %1585 = vtanh.f32 %v1050_v37 }
  0xb7   : > { %1432 = vmatpush3.msra.mxu1 %v1554_v31  ;;  %1422 = vmatprep.subr.mxu0 %v1724_v10  ;;  %v1562_v39 = vpop.eup %1561  ;;  %1587 = vtanh.f32 %v946_v41 }
  0xb8   : > { %1433 = vmatprep.subr.mxu1 %v1724_v10  ;;  %1423 = vmatpush3.msra.mxu0 %v1556_v32  ;;  %v1564_v42 = vpop.eup %1563  ;;  %1589 = vtanh.f32 %v1049_v12 }
  0xb9   : > { %1434 = vmatpush3.msra.mxu1 %v1558_v33  ;;  %1424 = vmatprep.subr.mxu0 %v1724_v10  ;;  %v1566_v13 = vpop.eup %1565  ;;  %1591 = vtanh.f32 %v945_v44 }
  0xba   : > { %1435 = vmatprep.subr.mxu1 %v1724_v10  ;;  %1425 = vmatpush3.msra.mxu0 %v1560_v36  ;;  %v1568_v47 = vpop.eup %1567  ;;  %1593 = vtanh.f32 %v1048_v46 }
  0xbb   : > { %1436 = vmatpush3.msra.mxu1 %v1562_v39  ;;  %1426 = vmatprep.subr.mxu0 %v1724_v10  ;;  %v1570_v21 = vpop.eup %1569  ;;  %1595 = vtanh.f32 %v944_v16 }
  0xbc   : > { %1437 = vmatprep.subr.mxu1 %v1724_v10  ;;  %1427 = vmatpush3.msra.mxu0 %v1564_v42  ;;  %v1572_v25 = vpop.eup %1571  ;;  %1597 = vtanh.f32 %v1047_v48 }
  0xbd   : > { %1428 = vmatprep.mubr.msk.f32.mxu0 %vm1725_vm0, %v1724_v10  ;;  %1438 = vmatpush3.msra.mxu1 %v1566_v13  ;;  %v1574_v49 = vpop.eup %1573 }
  0xbe   : > { %1439 = vmatprep.mubr.msk.f32.mxu1 %vm1725_vm0, %v1724_v10  ;;  %1429 = vmatmul.mubr.msk.f32.vlgmr.msra.gmra.mxu0 %vm330_vm1, %v1925_v15  ;;  %v1576_v34 = vpop.eup %1575 }
  0xbf   : > { %1440 = vmatmul.mubr.msk.f32.vlgmr.msra.gmra.mxu1 %vm330_vm1, %v1925_v15  ;;  %1442 = vmatprep.subr.mxu0 %v1724_v10  ;;  %v1578_v50 = vpop.eup %1577 }
  0xc0   : > { %1453 = vmatprep.subr.mxu1 %v1724_v10  ;;  %1443 = vmatpush3.msra.mxu0 %v1568_v47  ;;  %v1580_v51 = vpop.eup %1579 }
  0xc1   : > { %1454 = vmatpush3.msra.mxu1 %v1570_v21  ;;  %1444 = vmatprep.subr.mxu0 %v1724_v10  ;;  %v1582_v52 = vpop.eup %1581 }
  0xc2   : > { %1455 = vmatprep.subr.mxu1 %v1724_v10  ;;  %1445 = vmatpush3.msra.mxu0 %v1572_v25  ;;  %v1584_v53 = vpop.eup %1583 }
  0xc3   : > { %1456 = vmatpush3.msra.mxu1 %v1574_v49  ;;  %1446 = vmatprep.subr.mxu0 %v1724_v10  ;;  %v1586_v54 = vpop.eup %1585 }
  0xc4   : > { %1457 = vmatprep.subr.mxu1 %v1724_v10  ;;  %1447 = vmatpush3.msra.mxu0 %v1576_v34  ;;  %v1588_v55 = vpop.eup %1587 }
  0xc5   : > { %1458 = vmatpush3.msra.mxu1 %v1578_v50  ;;  %1448 = vmatprep.subr.mxu0 %v1724_v10  ;;  %v1590_v56 = vpop.eup %1589 }
  0xc6   : > { %1459 = vmatprep.subr.mxu1 %v1724_v10  ;;  %1449 = vmatpush3.msra.mxu0 %v1580_v51  ;;  %v1592_v57 = vpop.eup %1591 }
  0xc7   : > { %1450 = vmatprep.mubr.msk.f32.mxu0 %vm1725_vm0, %v1724_v10  ;;  %1460 = vmatpush3.msra.mxu1 %v1582_v52  ;;  %v1594_v58 = vpop.eup %1593 }
  0xc8   : > { %1461 = vmatprep.mubr.msk.f32.mxu1 %vm1725_vm0, %v1724_v10  ;;  %1451 = vmatmul.mubr.msk.f32.vlgmr.msra.gmra.mxu0 %vm330_vm1, %v1925_v15  ;;  %v1596_v59 = vpop.eup %1595 }
  0xc9   : > { %1462 = vmatmul.mubr.msk.f32.vlgmr.msra.gmra.mxu1 %vm330_vm1, %v1925_v15  ;;  %1464 = vmatprep.subr.mxu0 %v1724_v10  ;;  %v1598_v60 = vpop.eup %1597 }
  0xca   : > { %1475 = vmatprep.subr.mxu1 %v1724_v10  ;;  %1465 = vmatpush3.msra.mxu0 %v1584_v53 }
  0xcb   : > { %1476 = vmatpush3.msra.mxu1 %v1586_v54  ;;  %1466 = vmatprep.subr.mxu0 %v1724_v10 }
  0xcc   : > { %1477 = vmatprep.subr.mxu1 %v1724_v10  ;;  %1467 = vmatpush3.msra.mxu0 %v1588_v55 }
  0xcd   : > { %1478 = vmatpush3.msra.mxu1 %v1590_v56  ;;  %1468 = vmatprep.subr.mxu0 %v1724_v10 }
  0xce   : > { %1479 = vmatprep.subr.mxu1 %v1724_v10  ;;  %1469 = vmatpush3.msra.mxu0 %v1592_v57 }
  0xcf   : > { %1480 = vmatpush3.msra.mxu1 %v1594_v58  ;;  %1470 = vmatprep.subr.mxu0 %v1724_v10 }
  0xd0   : > { %1481 = vmatprep.subr.mxu1 %v1724_v10  ;;  %1471 = vmatpush3.msra.mxu0 %v1596_v59 }
  0xd1   : > { %1472 = vmatprep.mubr.msk.f32.mxu0 %vm1725_vm0, %v1724_v10  ;;  %1482 = vmatpush3.msra.mxu1 %v1598_v60 }
  0xd2   : > { %1483 = vmatprep.mubr.msk.f32.mxu1 %vm1725_vm0, %v1724_v10  ;;  %1473 = vmatmul.mubr.msk.f32.vlgmr.msra.gmra.mxu0 %vm330_vm1, %v1925_v15 }
  0xd3   : > { %1484 = vmatmul.mubr.msk.f32.vlgmr.msra.gmra.mxu1 %vm330_vm1, %v1925_v15 }
 0x174   : > { %v400_v62 = vpop.f32.mrf.mxu0 }
 0x175   : > { %v2011_v63 = vadd.f32 %v400_v62, %v2008_v61  ;;  %v503_v0 = vpop.f32.mrf.mxu1 }
 0x176   : > { %v2014_v1 = vadd.f32 %v503_v0, %v2008_v61  ;;  %v1408_v2 = vpop.f32.mrf.mxu0 }
 0x177   : > { %v405_v3 = vand.u32 2147483647, %v2011_v63  ;;  %v1419_v10 = vpop.f32.mrf.mxu1 }
 0x178   : > { %v508_v4 = vand.u32 2147483647, %v2014_v1  ;;  %v1142_v35 = vrot.slane %v2014_v1, 7 }
 0x179   : > { %v406_v5 = vsub.f32 0.0, %v405_v3 }
 0x17a   : > { %v509_v6 = vsub.f32 0.0, %v508_v4  ;;  %v1163_v41 = vsel %vm1162_vm2, %v2011_v63, %v1142_v35 }
 0x17b   : > { %v407_v8 = vmul.f32 1.442695, %v406_v5 }
 0x17c   : > { %v510_v22 = vmul.f32 1.442695, %v509_v6 }
 0x17d   : > { %1599 = vpow2.f32 %v407_v8 }
 0x17e   : > { %v606_v7 = vpop.f32.mrf.mxu0  ;;  %1601 = vpow2.f32 %v510_v22 }
 0x17f   : > { %v2019_v9 = vadd.f32 %v606_v7, %v2008_v61  ;;  %v709_v15 = vpop.f32.mrf.mxu1 }
 0x180   : > { %v2022_v17 = vadd.f32 %v709_v15, %v2008_v61  ;;  %v1430_v18 = vpop.f32.mrf.mxu0 }
 0x181   : > { %v611_v19 = vand.u32 2147483647, %v2019_v9  ;;  %v1441_v20 = vpop.f32.mrf.mxu1  ;;  %v1145_v37 = vrot.slane %v2019_v9, 6 }
 0x182   : > { %v714_v23 = vand.u32 2147483647, %v2022_v17  ;;  %v1148_v42 = vrot.slane %v2022_v17, 5 }
 0x183   : > { %v612_v24 = vsub.f32 0.0, %v611_v19  ;;  %v1165_v12 = vsel %vm1164_vm3, %v1163_v41, %v1145_v37 }
 0x184   : > { %v715_v26 = vsub.f32 0.0, %v714_v23  ;;  %v1167_v25 = vsel %vm1166_vm4, %v1165_v12, %v1148_v42 }
 0x185   : > { %v613_v27 = vmul.f32 1.442695, %v612_v24 }
 0x186   : > { %v716_v28 = vmul.f32 1.442695, %v715_v26 }
 0x187   : > { %1603 = vpow2.f32 %v613_v27 }
 0x188   : > { %1605 = vpow2.f32 %v716_v28  ;;  %v812_v29 = vpop.f32.mrf.mxu0 }
 0x189   : > { %v2027_v30 = vadd.f32 %v812_v29, %v2008_v61  ;;  %v915_v31 = vpop.f32.mrf.mxu1 }
 0x18a   : > { %v1452_v32 = vpop.f32.mrf.mxu0  ;;  %v2030_v33 = vadd.f32 %v915_v31, %v2008_v61  ;;  %v2036_v40 = vpop.eup %1599 }
 0x18b   : > { %v1463_v11 = vpop.f32.mrf.mxu1  ;;  %v817_v36 = vand.u32 2147483647, %v2027_v30  ;;  %v1151_v44 = vrot.slane %v2027_v30, 4  ;;  %v2046_v46 = vpop.eup %1601  ;;  %v409_v14 = vadd.f32 1.0, %v2036_v40 }
 0x18c   : > { %v920_v39 = vand.u32 2147483647, %v2030_v33  ;;  %v1154_v51 = vrot.slane %v2030_v33, 3  ;;  %v512_v54 = vadd.f32 1.0, %v2046_v46 }
 0x18d   : > { %v818_v38 = vsub.f32 0.0, %v817_v36  ;;  %v1169_v55 = vsel %vm1168_vm5, %v1167_v25, %v1151_v44 }
 0x18e   : > { %v921_v13 = vsub.f32 0.0, %v920_v39 }
 0x18f   : > { %v819_v43 = vmul.f32 1.442695, %v818_v38 }
 0x190   : > { %v922_v16 = vmul.f32 1.442695, %v921_v13 }
 0x191   : > { %1607 = vpow2.f32 %v819_v43 }
 0x192   : > { %v1018_v45 = vpop.f32.mrf.mxu0  ;;  %1609 = vpow2.f32 %v922_v16 }
 0x193   : > { %v2050_v47 = vadd.f32 %v1018_v45, %v2008_v61  ;;  %v1121_v48 = vpop.f32.mrf.mxu1  ;;  %1611 = vlog2.f32 %v409_v14 }
 0x194   : > { %v2052_v21 = vpop.eup %1603  ;;  %v1474_v49 = vpop.f32.mrf.mxu0  ;;  %v2061_v52 = vadd.f32 %v1121_v48, %v2008_v61  ;;  %v1171_v61 = vsel %vm1170_vm6, %v1169_v55, %v1154_v51 }
 0x195   : > { %v2056_v34 = vpop.eup %1605  ;;  %v615_v50 = vadd.f32 1.0, %v2052_v21  ;;  %v1485_v53 = vpop.f32.mrf.mxu1  ;;  %v1023_v57 = vand.u32 2147483647, %v2050_v47  ;;  %v1157_v58 = vrot.slane %v2050_v47, 2 }
 0x196   : > { %v718_v56 = vadd.f32 1.0, %v2056_v34  ;;  %v1126_v60 = vand.u32 2147483647, %v2061_v52  ;;  %v1160_v62 = vrot.slane %v2061_v52, 1 }
 0x197   : > { %1613 = vlog2.f32 %v615_v50  ;;  %v1024_v59 = vsub.f32 0.0, %v1023_v57  ;;  %v1173_v0 = vsel %vm1172_vm7, %v1171_v61, %v1157_v58 }
 0x198   : > { %1615 = vlog2.f32 %v512_v54  ;;  %v1127_v3 = vsub.f32 0.0, %v1126_v60  ;;  %v1175_v10 = vsel %vm1174_vm8, %v1173_v0, %v1160_v62 }
 0x199   : > { %1617 = vlog2.f32 %v718_v56  ;;  %v1025_v2 = vmul.f32 1.442695, %v1024_v59  ;;  %1176 = vst [vmem:[%s246_s28] sm:$0xff] %v1175_v10 }
 0x19a   : > { %v1128_v4 = vmul.f32 1.442695, %v1127_v3 }
 0x19b   : > { %1619 = vpow2.f32 %v1025_v2 }
 0x19c   : > { %1644 = shalt.err (!%p1641_p3)
}
 0x19d   : > { %s1645_s17 = scalar_lea.hbm %s2080_s11, 128  ;;  %s1649_s9 = scalar_lea.hbm %s2217_s5, 256 }
 0x19e   : > { %p1646_p4 = scmp.ne.s32.totalorder %s2080_s11, %s1645_s17  ;;  %p1650_p9 = scmp.lt.s32.totalorder %s2080_s11, %s2217_s5 }
 0x19f   : > { %p1651_p10 = scmp.lt.s32.totalorder %s1649_s9, %s1645_s17 }
 0x1a0   : > { %p1647_p7 = pnand %p1646_p4, %p1801_p5 }
 0x1a1   : > { %p1652_p11 = por %p1651_p10, %p1650_p9 }
 0x1a2   : > { %p1648_p8 = pneg %p1647_p7 }
 0x1a4   : > { %p1653_p12 = pnand %p1652_p11, %p1648_p8 }
 0x1a6   : > { %1656 = shalt.err (!%p1653_p12)
}
 0x1a7   : > { %1486 = dma.vmem_to_hbm [thread:$0]  (%p1801_p5), %s2082_s29, 128, %s2080_s11, %s1207_s12   ;;  %v1608_v5 = vpop.eup %1607  ;;  %1621 = vpow2.f32 %v1128_v4  ;;  %v412_v7 = vmul.f32 -0.5, %v2036_v40  ;;  %v618_v15 = vmul.f32 -0.5, %v2052_v21  ;;  %v515_v20 = vmul.f32 -0.5, %v2046_v46 }
 0x1a8   : > { %v821_v6 = vadd.f32 1.0, %v1608_v5  ;;  %v2107_v8 = vpop.eup %1609  ;;  %v721_v23 = vmul.f32 -0.5, %v2056_v34  ;;  %v415_v26 = vand.u32 2147483647, %v2036_v40  ;;  %v404_v29 = vmax.f32 %v2011_v63, 0.0  ;;  %s253_s29 = scalar_lea.vmem [#allocation4], %s1333_s20  ;;  %s2175_s15 = scalar_lea.hbm %s2218_s6, %s1354_s26 }
 0x1a9   : > { %v924_v18 = vadd.f32 1.0, %v2107_v8  ;;  %v1612_v19 = vpop.eup %1611  ;;  %v413_v22 = vadd.f32 1.0, %v412_v7  ;;  %v619_v27 = vadd.f32 1.0, %v618_v15  ;;  %v516_v11 = vadd.f32 1.0, %v515_v20  ;;  %s1238_s11 = sshll.u32 %s253_s29, 4  ;;  %s1212_s16 = scalar_lea.sflag [#allocation5], %s2043_s19  ;;  %s1239_s11 = int_to_ptr.vmem [resolvable:$true] %s1238_s11 }
 0x1aa   : > { %1623 = vlog2.f32 %v821_v6  ;;  %v1614_v24 = vpop.eup %1613  ;;  %v411_v31 = vmul.f32 0.6931472, %v1612_v19  ;;  %v610_v35 = vmax.f32 %v2019_v9, 0.0  ;;  %v621_v36 = vand.u32 2147483647, %v2052_v21  ;;  %s1657_s17 = scalar_lea.vmem %s1239_s11, 128 }
 0x1ab   : > { %1625 = vlog2.f32 %v924_v18  ;;  %v1616_v28 = vpop.eup %1615  ;;  %v824_v37 = vmul.f32 -0.5, %v1608_v5  ;;  %v414_v38 = vmul.f32 %v2036_v40, %v413_v22  ;;  %v518_v39 = vand.u32 2147483647, %v2046_v46  ;;  %p1658_p13 = scmp.ne.s32.totalorder %s1239_s11, %s1657_s17  ;;  %s1727_s20 = smov [#allocation4]  }
 0x1ac   : > { %v1618_v32 = vpop.eup %1617  ;;  %v617_v41 = vmul.f32 0.6931472, %v1614_v24  ;;  %v722_v42 = vadd.f32 1.0, %v721_v23  ;;  %vm2121_vm9 = vcmp.lt.f32.partialorder %v415_v26, 0.0004427343  ;;  %v620_v13 = vmul.f32 %v2052_v21, %v619_v27  ;;  %s1661_s18 = sshll.u32 %s1727_s20, 4  ;;  %s1662_s18 = int_to_ptr.vmem [resolvable:$false] %s1661_s18 }
 0x1ad   : > { %v2119_v43 = vpop.eup %1619  ;;  %v514_v63 = vmul.f32 0.6931472, %v1616_v28  ;;  %v724_v9 = vand.u32 2147483647, %v2056_v34  ;;  %v417_v44 = vsel %vm2121_vm9, %v414_v38, %v411_v31  ;;  %v720_v45 = vmul.f32 0.6931472, %v1618_v32  ;;  %p1659_p0 = pnand %p1658_p13, %p1801_p5  ;;  %p1664_p2 = scmp.lt.s32.totalorder %s1239_s11, %s1662_s18 }
 0x1ae   : > { %v927_v40 = vmul.f32 -0.5, %v2107_v8  ;;  %v1027_v14 = vadd.f32 1.0, %v2119_v43  ;;  %v517_v48 = vmul.f32 %v2046_v46, %v516_v11  ;;  %vm2134_vm10 = vcmp.lt.f32.partialorder %v621_v36, 0.0004427343  ;;  %s1663_s28 = scalar_lea.vmem %s1662_s18, 256 }
 0x1af   : > { %v713_v21 = vmax.f32 %v2022_v17, 0.0  ;;  %v825_v49 = vadd.f32 1.0, %v824_v37  ;;  %v623_v50 = vsel %vm2134_vm10, %v620_v13, %v617_v41  ;;  %v723_v51 = vmul.f32 %v2056_v34, %v722_v42  ;;  %p1660_p1 = pneg %p1659_p0  ;;  %p1665_p3 = scmp.lt.s32.totalorder %s1663_s28, %s1657_s17 }
 0x1b0   : > { %v827_v53 = vand.u32 2147483647, %v1608_v5  ;;  %1627 = vlog2.f32 %v1027_v14  ;;  %v418_v54 = vadd.f32 %v417_v44, %v404_v29  ;;  %vm2142_vm11 = vcmp.lt.f32.partialorder %v518_v39, 0.0004427343 }
 0x1b1   : > { %vm725_vm12 = vcmp.lt.f32.partialorder %v724_v9, 0.0004427343  ;;  %v520_v17 = vsel %vm2142_vm11, %v517_v48, %v514_v63  ;;  %v928_v58 = vadd.f32 1.0, %v927_v40  ;;  %v930_v59 = vand.u32 2147483647, %v2107_v8  ;;  %p1666_p4 = por %p1665_p3, %p1664_p2 }
 0x1b2   : > { %v726_v57 = vsel %vm725_vm12, %v723_v51, %v720_v45  ;;  %v624_v60 = vadd.f32 %v623_v50, %v610_v35  ;;  %v826_v61 = vmul.f32 %v1608_v5, %v825_v49  ;;  %v507_v62 = vmax.f32 %v2014_v1, 0.0 }
 0x1b3   : > { %vm828_vm13 = vcmp.lt.f32.partialorder %v827_v53, 0.0004427343  ;;  %v419_v2 = vadd.f32 1e-06, %v418_v54  ;;  %v727_v3 = vadd.f32 %v726_v57, %v713_v21  ;;  %v816_v10 = vmax.f32 %v2027_v30, 0.0  ;;  %p1667_p7 = pnand %p1666_p4, %p1660_p1 }
 0x1b4   : > { %v2131_v16 = vpop.eup %1621  ;;  %v521_v6 = vadd.f32 %v520_v17, %v507_v62  ;;  %v929_v15 = vmul.f32 %v2107_v8, %v928_v58  ;;  %v1030_v18 = vmul.f32 -0.5, %v2119_v43  ;;  %v625_v19 = vadd.f32 1e-06, %v624_v60 }
 0x1b5   : > { %v1130_v46 = vadd.f32 1.0, %v2131_v16  ;;  %vm931_vm14 = vcmp.lt.f32.partialorder %v930_v59, 0.0004427343  ;;  %v919_v5 = vmax.f32 %v2030_v33, 0.0  ;;  %v1178_v1 = vrot.slane %v419_v2, 1 }
 0x1b6   : > { %v728_v23 = vadd.f32 1e-06, %v727_v3  ;;  %v1133_v24 = vmul.f32 -0.5, %v2131_v16  ;;  %v522_v26 = vadd.f32 1e-06, %v521_v6  ;;  %v1031_v30 = vadd.f32 1.0, %v1030_v18 }
 0x1b7   : > { %v1624_v56 = vpop.eup %1623  ;;  %1629 = vlog2.f32 %v1130_v46  ;;  %v1181_v28 = vrot.slane %v625_v19, 7  ;;  %v1033_v31 = vand.u32 2147483647, %v2119_v43  ;;  %v1136_v38 = vand.u32 2147483647, %v2131_v16 }
 0x1b8   : > { %v823_v34 = vmul.f32 0.6931472, %v1624_v56  ;;  %v1626_v0 = vpop.eup %1625  ;;  %v1198_v32 = vsel %vm1162_vm2, %v1178_v1, %v522_v26  ;;  %v1184_v11 = vrot.slane %v728_v23, 6  ;;  %v1134_v35 = vadd.f32 1.0, %v1133_v24 }
 0x1b9   : > { %v926_v7 = vmul.f32 0.6931472, %v1626_v0  ;;  %v1032_v33 = vmul.f32 %v2119_v43, %v1031_v30  ;;  %v1199_v39 = vsel %vm1164_vm3, %v1198_v32, %v1181_v28  ;;  %v1022_v42 = vmax.f32 %v2050_v47, 0.0 }
 0x1ba   : > { %v829_v4 = vsel %vm828_vm13, %v826_v61, %v823_v34  ;;  %vm1034_vm15 = vcmp.lt.f32.partialorder %v1033_v31, 0.0004427343  ;;  %v1135_v44 = vmul.f32 %v2131_v16, %v1134_v35  ;;  %v1200_v45 = vsel %vm1166_vm4, %v1199_v39, %v1184_v11 }
 0x1bb   : > { %v830_v20 = vadd.f32 %v829_v4, %v816_v10  ;;  %v932_v22 = vsel %vm931_vm14, %v929_v15, %v926_v7  ;;  %v1125_v43 = vmax.f32 %v2061_v52, 0.0  ;;  %vm1137_vm0 = vcmp.lt.f32.partialorder %v1136_v38, 0.0004427343 }
 0x1bc   : > { %v933_v27 = vadd.f32 %v932_v22, %v919_v5 }
 0x1bd   : > { %v831_v29 = vadd.f32 1e-06, %v830_v20  ;;  %v1628_v8 = vpop.eup %1627 }
 0x1be   : > { %v934_v36 = vadd.f32 1e-06, %v933_v27  ;;  %v1029_v37 = vmul.f32 0.6931472, %v1628_v8 }
 0x1bf   : > { %v1187_v41 = vrot.slane %v831_v29, 5 }
 0x1c0   : > { %v1035_v63 = vsel %vm1034_vm15, %v1032_v33, %v1029_v37  ;;  %v1190_v40 = vrot.slane %v934_v36, 4 }
 0x1c1   : > { %v1036_v13 = vadd.f32 %v1035_v63, %v1022_v42  ;;  %v1201_v47 = vsel %vm1168_vm5, %v1200_v45, %v1187_v41 }
 0x1c2   : > { %v1202_v50 = vsel %vm1170_vm6, %v1201_v47, %v1190_v40 }
 0x1c3   : > { %v1037_v14 = vadd.f32 1e-06, %v1036_v13 }
 0x1c4   : > { %v1630_v12 = vpop.eup %1629 }
 0x1c5   : > { %v1132_v9 = vmul.f32 0.6931472, %v1630_v12  ;;  %v1193_v21 = vrot.slane %v1037_v14, 3 }
 0x1c7   : > { %v1138_v48 = vsel %vm1137_vm0, %v1135_v44, %v1132_v9  ;;  %v1203_v16 = vsel %vm1172_vm7, %v1202_v50, %v1193_v21 }
 0x1c8   : > { %v1139_v25 = vadd.f32 %v1138_v48, %v1125_v43 }
 0x1ca   : > { %v1140_v49 = vadd.f32 1e-06, %v1139_v25 }
 0x1cc   : > { %v1196_v51 = vrot.slane %v1140_v49, 2 }
 0x1ce   : > { %v1204_v52 = vsel %vm1174_vm8, %v1203_v16, %v1196_v51 }
 0x1cf   : > { %1205 = vst [vmem:[%s253_s29] sm:$0xff] %v1204_v52 }
 0x1d0   : > { %1670 = shalt.err (!%p1667_p7)
}
 0x1d1   : > { %s1671_s25 = scalar_lea.hbm %s2175_s15, 128  ;;  %s1675_s9 = scalar_lea.hbm %s2218_s6, 256 }
 0x1d2   : > { %p1672_p8 = scmp.ne.s32.totalorder %s2175_s15, %s1671_s25  ;;  %p1676_p11 = scmp.lt.s32.totalorder %s2175_s15, %s2218_s6 }
 0x1d3   : > { %p1677_p12 = scmp.lt.s32.totalorder %s1675_s9, %s1671_s25 }
 0x1d4   : > { %p1673_p9 = pnand %p1672_p8, %p1801_p5 }
 0x1d5   : > { %p1678_p13 = por %p1677_p12, %p1676_p11 }
 0x1d6   : > { %p1674_p10 = pneg %p1673_p9 }
 0x1d8   : > { %p1679_p0 = pnand %p1678_p13, %p1674_p10 }
 0x1da   : > { %1682 = shalt.err (!%p1679_p0)
}
 0x1db   : > { %1487 = dma.vmem_to_hbm [thread:$0]  (%p1801_p5), %s1239_s11, 128, %s2175_s15, %s1212_s16  }
 0x1dc PF: > { %p1497_p1 = scmp.ge.s32.totalorder %s1721_s24, 2  ;;  %s1250_s29 = sand.u32 1, %s1709_s21  }
 0x1dd   : > { %s1251_s12 = scalar_lea.sflag [#allocation3], %s1250_s29 }
 0x1de   : > { %p1491_p2 = pnand %p1497_p1, %p1805_p6 }
 0x1e0   : > { %p1492_p3 = pneg %p1491_p2 }
 0x1e2   : > { %1700 = dma.done.wait (%p1492_p3), %s1251_s12, 128  }
 0x1e3   : > { %1702 = vsyncadd (%p1492_p3), %s1251_s12, 4294967168  ;;  %s1260_s13 = scalar_lea.sflag [#allocation5], %s1250_s29 }
 0x1e4   : > { %1704 = dma.done.wait (%p1492_p3), %s1260_s13, 128  }
 0x1e5   : > { %1706 = vsyncadd (%p1492_p3), %s1260_s13, 4294967168  ;;  %p20_p5 = scmp.ge.s32.totalorder %s1788_s27, 4   ;;  %s2227_s21 = smov %s1713_s22 }
 0x1e6   : > { %s2228_s22 = smov %s1717_s23  ;;  %s2229_s23 = smov %s1799_s30 }
 0x1e7   : > { %s2230_s24 = smov %s1788_s27  ;;  %22 = sbr.rel (!%p20_p5) target bundleno = 5 (0x5), region = 92 }
 0x1ec   :  { %1265 = vsyncpa [#allocation3], 1 }
 0x1ed   :  { %1267 = vsyncpa [#allocation3 + $0x1], 1 }
 0x1ee   :  { %1268 = vsyncpa [#allocation5], 1 }
 0x1ef   :  { %1270 = vsyncpa [#allocation5 + $0x1], 1 }

</bundles_post_ra>
